<compile_context>
chip_gen: v6e
topology: v6e:2x2x1
jax: 0.10.0
libtpu: 0.0.40
codegen_flags: <defaults>
</compile_context>

<pallas_src>
import functools

import jax
import jax.numpy as jnp
from jax.experimental import pallas as pl
from jax.experimental.pallas import tpu as pltpu


# --------------------------------------------------------------------------- #
# Kernel body
# --------------------------------------------------------------------------- #
def _flatten_head_kernel(x_ref, w_ref, b_ref, o_ref):
    # x_ref: [TM, K]   w_ref: [K, N]   b_ref: [1, N]   o_ref: [TM, N]
    acc = jnp.dot(x_ref[...], w_ref[...], preferred_element_type=jnp.float32)
    acc = acc + b_ref[...].astype(jnp.float32)
    # Dropout is identity at inference time (module eval mode).
    # TODO(synk): training-mode dropout (random mask via pltpu.prng_*) is not implemented.
    o_ref[...] = acc.astype(o_ref.dtype)


# --------------------------------------------------------------------------- #
# Tiling helpers
# --------------------------------------------------------------------------- #
def _sublane_multiple(dtype):
    # f32 -> 8, bf16 -> 16, int8/fp8 -> 32 (packed (k,128) tile constraint).
    return max(8, 32 // jnp.dtype(dtype).itemsize)


def _vmem_capacity_bytes():
    try:
        return int(pltpu.get_tpu_info().vmem_capacity_bytes)
    except Exception:
        return 64 * 1024 * 1024  # conservative fallback (v7x per-TC VMEM)


def _choose_row_tile(M, K, N, x_dtype, out_dtype, resident_bytes):
    """Byte-budgeted, generation-aware row tile for the streamed x / out blocks."""
    sub = _sublane_multiple(x_dtype)
    if M <= sub:
        return M  # single block == full second-to-last dim (always legal)

    vmem_cap = _vmem_capacity_bytes()
    x_item = jnp.dtype(x_dtype).itemsize
    o_item = jnp.dtype(out_dtype).itemsize

    # Reserve the single-buffered resident weight/bias plus compiler scratch,
    # then spend ~70% of the remainder on the double-buffered streamed slabs.
    avail = max(4 << 20, vmem_cap - resident_bytes - (4 << 20))
    budget = int(0.7 * avail)
    per_row = 2 * (K * x_item + N * o_item)  # double-buffered x + out bytes per row
    cap_rows = max(sub, budget // per_row)

    # Megacore: keep >= 2 row tiles so the "parallel" axis can shard across the
    # two v7x TensorCores (harmless on single-TC v5e/v6e).
    half_rows = -(-M // 2)
    tm = min(cap_rows, half_rows)
    tm = max(sub, (tm // sub) * sub)  # sublane-multiple rounding
    return min(tm, M)


def _resident_spec(block_shape):
    # Constant-index, VMEM-resident operand: single-buffer it to save VMEM.
    try:
        return pl.BlockSpec(block_shape, lambda i: (0, 0),
                            pipeline_mode=pl.Buffered(1))
    except TypeError:  # very old pallas without pipeline_mode
        return pl.BlockSpec(block_shape, lambda i: (0, 0))


# --------------------------------------------------------------------------- #
# Weight preparation (hoist out of the per-call path; run once per weight)
# --------------------------------------------------------------------------- #
def prepare_flatten_head_params(weight, bias, patch_nums, p_total, stream_dtype=None):
    """Precompute the operands consumed by the Pallas kernel.

    weight: [pred_len, head_nf] (PyTorch nn.Linear layout), head_nf = d_ff*patch_nums
    Returns (w_kernel, b_kernel, slice_x):
      slice_x=False: trailing-patch slice folded into a zero-padded weight of
                     shape [d_ff*p_total, pred_len]; x is streamed un-sliced.
      slice_x=True : large discard fraction; weight only re-laid-out to
                     [d_ff*patch_nums, pred_len] and x gets one XLA pre-slice.
    """
    pred_len, head_nf = weight.shape
    assert head_nf % patch_nums == 0
    d_ff = head_nf // patch_nums
    assert patch_nums <= p_total

    slice_x = p_total > 3 * patch_nums

    w3 = weight.reshape(pred_len, d_ff, patch_nums)  # [N, D, P]
    w3 = jnp.transpose(w3, (1, 2, 0))                # [D, P, N]
    if not slice_x:
        # Zero rows for the discarded leading patches: flatten index d*P_total+p
        # maps to weight column d*patch_nums + (p - (P_total - patch_nums)).
        w3 = jnp.pad(w3, ((0, 0), (p_total - patch_nums, 0), (0, 0)))
    w_kernel = w3.reshape(-1, pred_len)              # [K, N]
    if stream_dtype is not None:
        w_kernel = w_kernel.astype(stream_dtype)
    b_kernel = bias.reshape(1, pred_len).astype(jnp.float32)
    return w_kernel, b_kernel, slice_x


# --------------------------------------------------------------------------- #
# Forward
# --------------------------------------------------------------------------- #
def flatten_head_forward(x, w_kernel, b_kernel, patch_nums, *, slice_x,
                         stream_dtype=None, out_dtype=None):
    """x: [B, V, d_ff, P_total] -> [B, pred_len, V]  (eval-mode FlattenHead)."""
    B, V, D, P_total = x.shape
    K, N = w_kernel.shape
    out_dtype = x.dtype if out_dtype is None else out_dtype

    if slice_x:
        # Large discard fraction: one XLA slice is cheaper than streaming the
        # discarded leading patches through the bandwidth-bound kernel.
        x = x[:, :, :, -patch_nums:]
    if stream_dtype is not None and x.dtype != stream_dtype:
        # NOTE: if upstream activations are already bf16, pass them directly
        # (do not upcast); this cast is only for f32-producing upstreams.
        x = x.astype(stream_dtype)

    M = B * V
    assert D * x.shape[-1] == K, (D * x.shape[-1], K)
    x_flat = x.reshape(M, K)  # contiguous row-major merge, no HBM copy

    x_item = jnp.dtype(x_flat.dtype).itemsize
    o_item = jnp.dtype(out_dtype).itemsize
    w_item = jnp.dtype(w_kernel.dtype).itemsize
    w_bytes = K * N * w_item                       # single-buffered resident weight
    b_bytes = 8 * max(N, 128) * 4                  # padded (1, N) f32 tile

    tm = _choose_row_tile(M, K, N, x_flat.dtype, out_dtype, w_bytes + b_bytes)
    grid_m = pl.cdiv(M, tm)

    # Explicit scoped-VMEM limit sized from the real footprint (+ headroom).
    vmem_needed = (2 * tm * K * x_item      # x double-buffer
                   + 2 * tm * N * o_item    # out double-buffer
                   + w_bytes + b_bytes      # single-buffered residents
                   + (2 << 20))             # headroom / compiler scratch
    vmem_limit = int(min(_vmem_capacity_bytes(), max(vmem_needed, 16 << 20)))

    cost = pl.CostEstimate(
        flops=2 * M * K * N,
        transcendentals=0,
        bytes_accessed=M * K * x_item + K * N * w_item + N * 4 + M * N * o_item,
    )

    out_flat = pl.pallas_call(
        _flatten_head_kernel,
        out_shape=jax.ShapeDtypeStruct((M, N), out_dtype),
        grid_spec=pltpu.PrefetchScalarGridSpec(
            num_scalar_prefetch=0,
            grid=(grid_m,),
            in_specs=[
                pl.BlockSpec((tm, K), lambda i: (i, 0)),  # streamed rows of x
                _resident_spec((K, N)),                   # VMEM-resident weight
                _resident_spec((1, N)),                   # VMEM-resident bias
            ],
            out_specs=pl.BlockSpec((tm, N), lambda i: (i, 0)),
        ),
        compiler_params=pltpu.CompilerParams(
            dimension_semantics=("parallel",),
            vmem_limit_bytes=vmem_limit,
        ),
        cost_estimate=cost,
    )(x_flat, w_kernel, b_kernel)

    out = out_flat.reshape(B, V, N)  # [B, V, pred_len]
    # TODO(synk): if profiling ever shows the masked (N < 128) output stores as
    # the binding slot, emit transposed [N, TM] blocks instead; output bytes are
    # tiny relative to x, so the final permute is left to XLA on the small result.
    return jnp.transpose(out, (0, 2, 1))  # [B, pred_len, V]


def flatten_head(x, weight, bias, patch_nums, *, stream_dtype=None, out_dtype=None):
    """Convenience one-shot wrapper (prepares weights per call).  In a real model
    call prepare_flatten_head_params once per weight and reuse its outputs."""
    w_k, b_k, slice_x = prepare_flatten_head_params(
        weight, bias, patch_nums, x.shape[-1], stream_dtype=stream_dtype)
    return flatten_head_forward(x, w_k, b_k, patch_nums, slice_x=slice_x,
                                stream_dtype=stream_dtype, out_dtype=out_dtype)


# --------------------------------------------------------------------------- #
# Self-test
# --------------------------------------------------------------------------- #
if __name__ == "__main__":
    # Small config consistent with the module __init__ arithmetic.
    seq_len, stride = 16, 4
    patch_nums = int((seq_len - stride) / stride + 2)   # = 5
    d_ff, n_vars, pred_len, batch = 32, 4, 8, 2
    head_nf = d_ff * patch_nums                         # = 160
    p_total = patch_nums + 1                            # extra leading patch so the slice matters

    key = jax.random.PRNGKey(0)
    kx, kw, kb = jax.random.split(key, 3)
    x = jax.random.normal(kx, (batch, n_vars, d_ff, p_total), dtype=jnp.float32)
    weight = jax.random.normal(kw, (pred_len, head_nf), dtype=jnp.float32) * 0.02
    bias = jax.random.normal(kb, (pred_len,), dtype=jnp.float32) * 0.02

    def ref_forward(xi):
        xs = xi[:, :, :, -patch_nums:].reshape(xi.shape[0], xi.shape[1], head_nf)
        r = jnp.einsum("bvk,nk->bvn", xs, weight) + bias
        return jnp.transpose(r, (0, 2, 1))

    # 1) f32 path (fold-slice-into-weight branch); weight prep hoisted out of the call path.
    w_k, b_k, slice_x = prepare_flatten_head_params(weight, bias, patch_nums, p_total)
    fwd = jax.jit(functools.partial(flatten_head_forward,
                                    patch_nums=patch_nums, slice_x=slice_x))
    out = jax.block_until_ready(fwd(x, w_k, b_k))
    ref = ref_forward(x)
    assert out.shape == (batch, pred_len, n_vars)
    assert jnp.allclose(out, ref, atol=1e-5, rtol=1e-5)

    # 2) bf16-streamed operands (f32 MXU accumulation, f32 output), looser tolerance.
    out_bf16 = jax.block_until_ready(
        flatten_head(x, weight, bias, patch_nums,
                     stream_dtype=jnp.bfloat16, out_dtype=jnp.float32))
    assert jnp.allclose(out_bf16, ref, atol=3e-2, rtol=3e-2)

    # 3) large-discard input exercises the XLA pre-slice (slice_x=True) branch.
    p_big = 4 * patch_nums
    x_big = jax.random.normal(kx, (batch, n_vars, d_ff, p_big), dtype=jnp.float32)
    out_big = jax.block_until_ready(flatten_head(x_big, weight, bias, patch_nums))
    ref_big = ref_forward(x_big)
    assert jnp.allclose(out_big, ref_big, atol=1e-5, rtol=1e-5)

    print("KERNEL_OK")
</pallas_src>

<mosaic_0001>
module attributes {stable_mosaic.version = 11 : i64} {
  func.func @_flatten_head_kernel(%arg0: i32, %arg1: memref<8x192xf32, #tpu.memory_space<vmem>>, %arg2: memref<192x8xf32, #tpu.memory_space<vmem>>, %arg3: memref<1x8xf32, #tpu.memory_space<vmem>>, %arg4: memref<8x8xf32, #tpu.memory_space<vmem>>) attributes {dimension_semantics = [#tpu.dimension_semantics<parallel>], iteration_bounds = array<i64: 1>, scalar_prefetch = 0 : i64, scratch_operands = 0 : i64, tpu.core_type = #tpu.core_type<tc>, window_params = [{transform_indices = @transform_0, window_bounds = array<i64: 8, 192>}, {pipeline_mode = #tpu.pipeline_mode<synchronous>, transform_indices = @transform_1, window_bounds = array<i64: 192, 8>}, {pipeline_mode = #tpu.pipeline_mode<synchronous>, transform_indices = @transform_2, window_bounds = array<i64: 1, 8>}, {transform_indices = @transform_3, window_bounds = array<i64: 8, 8>}]} {
    %c0 = arith.constant 0 : index
    %c0_0 = arith.constant 0 : index
    %0 = vector.load %arg1[%c0, %c0_0] : memref<8x192xf32, #tpu.memory_space<vmem>>, vector<8x192xf32>
    %c0_1 = arith.constant 0 : index
    %c0_2 = arith.constant 0 : index
    %1 = vector.load %arg2[%c0_1, %c0_2] : memref<192x8xf32, #tpu.memory_space<vmem>>, vector<192x8xf32>
    %cst = arith.constant dense<0.000000e+00> : vector<8x8xf32>
    %2 = tpu.matmul %0, %1, %cst {dimension_numbers = #tpu.dot_dimension_numbers<[1], [0], [0], [1], [0, 0, 1, 1], [], []>} : vector<8x192xf32>, vector<192x8xf32>, vector<8x8xf32> -> vector<8x8xf32>
    %c0_3 = arith.constant 0 : index
    %c0_4 = arith.constant 0 : index
    %3 = vector.load %arg3[%c0_3, %c0_4] : memref<1x8xf32, #tpu.memory_space<vmem>>, vector<1x8xf32>
    %4 = vector.broadcast %3 : vector<1x8xf32> to vector<8x8xf32>
    %5 = arith.addf %2, %4 : vector<8x8xf32>
    %c0_5 = arith.constant 0 : index
    %c0_6 = arith.constant 0 : index
    %6 = vector.load %arg4[%c0_5, %c0_6] : memref<8x8xf32, #tpu.memory_space<vmem>>, vector<8x8xf32>
    tpu.vector_store %arg4[%c0_5, %c0_6], %5 {strides = array<i32>} : memref<8x8xf32, #tpu.memory_space<vmem>>, vector<8x8xf32>,
    return
  }
  func.func @transform_0(%arg0: i32) -> (i32, i32) {
    %c0_i32 = arith.constant 0 : i32
    %c0_i32_0 = arith.constant 0 : i32
    return %arg0, %c0_i32 : i32, i32
  }
  func.func @transform_1(%arg0: i32) -> (i32, i32) {
    %c0_i32 = arith.constant 0 : i32
    %c0_i32_0 = arith.constant 0 : i32
    %c0_i32_1 = arith.constant 0 : i32
    return %c0_i32, %c0_i32_0 : i32, i32
  }
  func.func @transform_2(%arg0: i32) -> (i32, i32) {
    %c0_i32 = arith.constant 0 : i32
    %c0_i32_0 = arith.constant 0 : i32
    %c0_i32_1 = arith.constant 0 : i32
    return %c0_i32, %c0_i32_0 : i32, i32
  }
  func.func @transform_3(%arg0: i32) -> (i32, i32) {
    %c0_i32 = arith.constant 0 : i32
    %c0_i32_0 = arith.constant 0 : i32
    return %arg0, %c0_i32 : i32, i32
  }
}

</mosaic_0001>

<bundles_post_ra>
// kernel: flatten_head_forward.1
= control target key start
LH: loop header
LB: loop body
LE: loop exit
PB: predicated region body
PF: predicated region fallthrough
CT: control target
= control target key end

     0   :  { %v164_v1 = vmov 0.0   ;;  %vm48_vm0 = vcmask 523264   ;;  %s294_s0 = inlined_call_operand.vmem [shape: f32[8,192], index: 0, kind: input, shape index: {}]   ;;  %s295_s1 = inlined_call_operand.vmem [shape: f32[192,8], index: 1, kind: input, shape index: {}]   ;;  %s296_s2 = inlined_call_operand.vmem [shape: f32[1,8], index: 2, kind: input, shape index: {}]   ;;  %s297_s3 = inlined_call_operand.hbm [shape: f32[8,8], index: 3, kind: output, shape index: {}]  }
   0x1   :  { %v32_v0 = vld [vmem:[%s295_s1 + $0x78] sm:$0xff]  ;;  %52 = vmatprep.subr.mxu0 %v164_v1  ;;  %v31_v2 = vld [vmem:[%s295_s1 + $0x70] sm:$0xff]  ;;  %v30_v3 = vld [vmem:[%s295_s1 + $0x68] sm:$0xff] }
   0x2   :  { %53 = vmatpush1.msra.mxu0 %v32_v0  ;;  %v29_v4 = vld [vmem:[%s295_s1 + $0x60] sm:$0xff]  ;;  %v28_v5 = vld [vmem:[%s295_s1 + $0x58] sm:$0xff]  ;;  %v16_v6 = vld [vmem:[%s294_s0 + $0x8] sm:$0xff] }
   0x3   :  { %54 = vmatprep.subr.mxu0 %v164_v1  ;;  %v27_v7 = vld [vmem:[%s295_s1 + $0x50] sm:$0xff]  ;;  %139 = vmatprep.mubr.msk.f32.mxu0 %vm48_vm0, %v16_v6 }
   0x4   :  { %55 = vmatpush1.msra.mxu0 %v31_v2 }
   0x5   :  { %56 = vmatprep.subr.mxu0 %v164_v1 }
   0x6   :  { %57 = vmatpush1.msra.mxu0 %v30_v3 }
   0x7   :  { %58 = vmatprep.subr.mxu0 %v164_v1 }
   0x8   :  { %59 = vmatpush1.msra.mxu0 %v29_v4 }
   0x9   :  { %60 = vmatprep.subr.mxu0 %v164_v1 }
   0xa   :  { %8 = vsyncpa [#allocation3], 0  ;;  %61 = vmatpush1.msra.mxu0 %v28_v5  ;;  %v26_v8 = vld [vmem:[%s295_s1 + $0x48] sm:$0xff]  ;;  %v25_v9 = vld [vmem:[%s295_s1 + $0x40] sm:$0xff]  ;;  %s165_s12 = smov [#allocation2]   ;;  %vm122_vm1 = vcmask 64512  }
   0xb   :  { %62 = vmatprep.subr.mxu0 %v164_v1  ;;  %v24_v10 = vld [vmem:[%s295_s1 + $0x38] sm:$0xff]  ;;  %v23_v11 = vld [vmem:[%s295_s1 + $0x30] sm:$0xff]  ;;  %v22_v12 = vld [vmem:[%s295_s1 + $0x28] sm:$0xff]  ;;  %s130_s13 = sshll.u32 %s165_s12, 4  ;;  %s131_s13 = int_to_ptr.vmem [resolvable:$true] %s130_s13 }
   0xc   :  { %63 = vmatpush1.msra.mxu0 %v27_v7  ;;  %v21_v13 = vld [vmem:[%s295_s1 + $0x20] sm:$0xff]  ;;  %v20_v14 = vld [vmem:[%s295_s1 + $0x18] sm:$0xff]  ;;  %v19_v15 = vld [vmem:[%s295_s1 + $0x10] sm:$0xff]  ;;  %p147_p1 = scmp.lt.s32.totalorder %s131_s13, %s131_s13 }
   0xd   :  { %64 = vmatprep.subr.mxu0 %v164_v1  ;;  %v18_v16 = vld [vmem:[%s295_s1 + $0x8] sm:$0xff]  ;;  %v17_v17 = vld [vmem:[%s295_s1] sm:$0xff]  ;;  %v40_v18 = vld [vmem:[%s295_s1 + $0xb8] sm:$0xff] }
   0xe   :  { %65 = vmatpush1.msra.mxu0 %v26_v8  ;;  %v39_v19 = vld [vmem:[%s295_s1 + $0xb0] sm:$0xff]  ;;  %v38_v20 = vld [vmem:[%s295_s1 + $0xa8] sm:$0xff]  ;;  %v37_v21 = vld [vmem:[%s295_s1 + $0xa0] sm:$0xff] }
   0xf   :  { %66 = vmatprep.subr.mxu0 %v164_v1  ;;  %v36_v22 = vld [vmem:[%s295_s1 + $0x98] sm:$0xff]  ;;  %v35_v23 = vld [vmem:[%s295_s1 + $0x90] sm:$0xff]  ;;  %v34_v24 = vld [vmem:[%s295_s1 + $0x88] sm:$0xff] }
  0x10   :  { %67 = vmatpush1.msra.mxu0 %v25_v9  ;;  %v33_v25 = vld [vmem:[%s295_s1 + $0x80] sm:$0xff]  ;;  %s142_s1 = scalar_lea.vmem %s131_s13, 128 }
  0x11   :  { %68 = vmatprep.subr.mxu0 %v164_v1  ;;  %v15_v26 = vld [vmem:[%s294_s0] sm:$0xff]  ;;  %p143_p0 = scmp.ne.s32.totalorder %s131_s13, %s142_s1  ;;  %p148_p2 = scmp.lt.s32.totalorder %s142_s1, %s142_s1 }
  0x12   :  { %69 = vmatpush1.msra.mxu0 %v24_v10  ;;  %v138_v27 = vld [vmem:[%s296_s2] ss:$0 sm:$0xff] }
  0x13   :  { %70 = vmatprep.subr.mxu0 %v164_v1  ;;  %p149_p3 = por %p148_p2, %p147_p1 }
  0x14   :  { %71 = vmatpush1.msra.mxu0 %v23_v11 }
  0x15   :  { %72 = vmatprep.subr.mxu0 %v164_v1  ;;  %p150_p4 = pnand %p149_p3, %p143_p0 }
  0x16   :  { %73 = vmatpush1.msra.mxu0 %v22_v12 }
  0x17   :  { %74 = vmatprep.subr.mxu0 %v164_v1 }
  0x18   :  { %75 = vmatpush1.msra.mxu0 %v21_v13 }
  0x19   :  { %76 = vmatprep.subr.mxu0 %v164_v1 }
  0x1a   :  { %77 = vmatpush1.msra.mxu0 %v20_v14 }
  0x1b   :  { %78 = vmatprep.subr.mxu0 %v164_v1 }
  0x1c   :  { %79 = vmatpush1.msra.mxu0 %v19_v15 }
  0x1d   :  { %80 = vmatprep.subr.mxu0 %v164_v1 }
  0x1e   :  { %81 = vmatpush1.msra.mxu0 %v18_v16 }
  0x1f   :  { %82 = vmatprep.subr.mxu0 %v164_v1 }
  0x20   :  { %83 = vmatpush1.msra.mxu0 %v17_v17 }
  0x21   :  { %100 = vmatprep.subr.mxu0 %v164_v1 }
  0x22   :  { %101 = vmatpush2.msra.mxu0 %v40_v18 }
  0x23   :  { %102 = vmatprep.subr.mxu0 %v164_v1 }
  0x24   :  { %103 = vmatpush2.msra.mxu0 %v39_v19 }
  0x25   :  { %104 = vmatprep.subr.mxu0 %v164_v1 }
  0x26   :  { %105 = vmatpush2.msra.mxu0 %v38_v20 }
  0x27   :  { %106 = vmatprep.subr.mxu0 %v164_v1 }
  0x28   :  { %107 = vmatpush2.msra.mxu0 %v37_v21 }
  0x29   :  { %108 = vmatprep.subr.mxu0 %v164_v1 }
  0x2a   :  { %109 = vmatpush2.msra.mxu0 %v36_v22 }
  0x2b   :  { %110 = vmatprep.subr.mxu0 %v164_v1 }
  0x2c   :  { %111 = vmatpush2.msra.mxu0 %v35_v23 }
  0x2d   :  { %112 = vmatprep.subr.mxu0 %v164_v1 }
  0x2e   :  { %113 = vmatpush2.msra.mxu0 %v34_v24 }
  0x2f   :  { %114 = vmatprep.subr.mxu0 %v164_v1 }
  0x30   :  { %115 = vmatpush2.msra.mxu0 %v33_v25 }
  0x31   :  { %117 = vmatmul.mubr.f32.vlgmr.msra.gmra.mxu0 %v15_v26 }
  0xf1   :  { %v118_v28 = vpop.f32.mrf.mxu0 }
  0xf2   :  { %v119_v29 = vadd.f32 %v138_v27, %v118_v28 }
  0xf3   :  { %v120_v30 = vpop.f32.mrf.mxu0 }
  0xf4   :  { %123 = vst.msk [vmem:[#allocation2] sm:$0xff] %vm122_vm1, %v119_v29 }
  0xf5   :  { %153 = shalt.err (!%p150_p4)
}
  0xf6   :  { %133 = dma.vmem_to_hbm [thread:$0]  %s131_s13, 128, %s297_s3, [#allocation3]  }
  0xf7   :  { %162 = dma.done.wait [#allocation3], 128  }
  0xf8   :  { %163 = vsyncadd [#allocation3], 4294967168 }
  0xf9   :  { %137 = vsyncpa [#allocation3], 1 }

</bundles_post_ra>
